<compile_context>
chip_gen: v7x
topology: tpu7x:2x2x1
jax: 0.10.0
libtpu: 0.0.40
codegen_flags: <defaults>
</compile_context>

<pallas_src>
import functools

import jax
import jax.numpy as jnp
from jax import lax
from jax.experimental import pallas as pl
from jax.experimental.pallas import tpu as pltpu

_SLACK = 2 << 20  # VMEM slack for Mosaic internals / metadata


def _ceil_to(x, n):
    return ((x + n - 1) // n) * n


@functools.lru_cache(maxsize=None)
def _vmem_budget_bytes():
    """~75% of physical per-core VMEM (leave headroom for Mosaic scratch)."""
    cap = 64 << 20  # conservative fallback (v7x per-TC VMEM)
    try:
        info = pltpu.get_tpu_info()
        cap = int(getattr(info, "vmem_capacity_bytes", cap)) or cap
    except Exception:
        pass
    return max((cap * 3) // 4, 32 << 20)


# ----------------------------------------------------------------------------- kernels
def _kernel_fused_single(p_ref, w_ref, s_ref, o_ref):
    # p_ref: (TM, K) bf16 patches, w_ref: (K, CP) bf16 resident weights,
    # s_ref: (1, CP) f32 shift, o_ref: (TM, CP) f32.
    acc = jnp.dot(p_ref[...], w_ref[...], preferred_element_type=jnp.float32)
    o_ref[...] = jnp.maximum(acc + s_ref[...], 0.0).astype(o_ref.dtype)


def _kernel_fused_ksplit(p_ref, w_ref, s_ref, o_ref, acc_ref, *, tk, resident):
    # K reduction on grid axis 1. If `resident`, w_ref is the full (KP, CP) matrix kept
    # in VMEM (constant block index -> fetched once) and sliced here; otherwise it is a
    # streamed (TK, CP) tile.
    kk = pl.program_id(1)

    @pl.when(kk == 0)
    def _():
        acc_ref[...] = jnp.zeros_like(acc_ref)

    if resident:
        start = pl.multiple_of(kk * tk, tk)
        w = w_ref[pl.ds(start, tk), :]
    else:
        w = w_ref[...]
    acc_ref[...] += jnp.dot(p_ref[...], w, preferred_element_type=jnp.float32)

    @pl.when(kk == pl.num_programs(1) - 1)
    def _():
        o_ref[...] = jnp.maximum(acc_ref[...] + s_ref[...], 0.0).astype(o_ref.dtype)


# ----------------------------------------------------------------------------- helpers
def _im2col(x_nchw, kh, kw, sh, sw, ph, pw):
    """(N,C,H,W) -> ((N*Hout*Wout, C*KH*KW), Hout, Wout); K ordered as (C, kh*kw)."""
    x = jnp.pad(x_nchw, ((0, 0), (0, 0), (ph, ph), (pw, pw)))
    n, c, h, w = x.shape
    hout = (h - kh) // sh + 1
    wout = (w - kw) // sw + 1
    taps = []
    for i in range(kh):
        for j in range(kw):
            taps.append(x[:, :, i:i + hout * sh:sh, j:j + wout * sw:sw])
    # (KH*KW, N, C, Hout, Wout) -> (N, Hout, Wout, C, KH*KW)
    p = jnp.stack(taps, axis=0).transpose(1, 3, 4, 2, 0)
    return p.reshape(n * hout * wout, c * kh * kw), hout, wout


def _pick_tm(m, cands, fits):
    """Largest feasible M tile, preferring >=4 grid steps (2/TC on v7x) and divisors
    of M (avoids an extra pad pass over the patch matrix)."""
    best, best_key = None, None
    for t in cands:
        if t > m or not fits(t):
            continue
        steps = -(-m // t)
        key = (min(steps, 4), m % t == 0, t)
        if best_key is None or key > best_key:
            best, best_key = t, key
    return best


# ----------------------------------------------------------------------------- wrapper
@functools.partial(jax.jit, static_argnames=("stride", "padding"))
def conv2d_bn_relu(x, conv_w, conv_b, bn_gamma, bn_beta, bn_mean, bn_var,
                   stride=(1, 1), padding=(0, 0), eps=1e-5):
    """x: (N, C_in, H, W) float32. Returns (N, C_out, H_out, W_out) float32."""
    n, cin, _, _ = x.shape
    cout, _, kh, kw = conv_w.shape
    sh, sw = stride
    ph, pw = padding

    # Fold BN into an affine: y = conv(x, w*scale) + shift, then ReLU.
    scale = bn_gamma / jnp.sqrt(bn_var + eps)                    # (C_out,)
    shift = (conv_b - bn_mean) * scale + bn_beta                 # (C_out,)

    # bf16 operands (f32 MXU accumulation) halve HBM/VMEM traffic.
    x_bf16 = x.astype(jnp.bfloat16)
    patches, hout, wout = _im2col(x_bf16, kh, kw, sh, sw, ph, pw)  # (M, K) bf16
    m, k = patches.shape

    w_mat = (conv_w.transpose(1, 2, 3, 0).reshape(k, cout)
             * scale[None, :]).astype(jnp.bfloat16)              # (K, C_out) bf16

    cp = _ceil_to(cout, 128)
    budget = _vmem_budget_bytes()
    cands = [t for t in (1024, 512, 256, 128) if t <= 512 or cp <= 256]

    # ---- plan selection ----------------------------------------------------
    # Path 1: single dot, full weights resident, no K grid axis, no K padding.
    def p1_bytes(t):
        return (2 * k * cp * 2            # resident weights (budget 2x to be safe)
                + 2 * t * k * 2           # patch double buffer
                + 2 * t * cp * 4          # output double buffer
                + 2 * cp * 4 + _SLACK)

    plan = None
    if m <= 128 and p1_bytes(m) <= budget:
        plan = ("single", m, None, k)
    else:
        tm = _pick_tm(m, cands, lambda t: p1_bytes(t) <= budget)
        if tm is not None:
            plan = ("single", tm, None, k)

    # Path 2: K split on the grid, weights still resident (sliced in-kernel).
    if plan is None:
        kp2 = _ceil_to(k, 128)
        tk2 = next(t for t in (512, 256, 128) if kp2 % t == 0)

        def p2_bytes(t):
            return (2 * kp2 * cp * 2 + 2 * t * tk2 * 2 + 2 * t * cp * 4
                    + t * cp * 4 + 2 * cp * 4 + _SLACK)

        tm = _pick_tm(m, cands, lambda t: p2_bytes(t) <= budget)
        if tm is not None:
            plan = ("resident_k", tm, tk2, kp2)

    # Path 3: streamed weight tiles (robust fallback for very large K*C_out).
    if plan is None:
        kp3 = _ceil_to(k, 128)
        tk3 = 128

        def p3_bytes(t):
            return (2 * t * tk3 * 2 + 2 * tk3 * cp * 2 + 2 * t * cp * 4
                    + t * cp * 4 + 2 * cp * 4 + _SLACK)

        tm = _pick_tm(m, cands, lambda t: p3_bytes(t) <= budget) or 128
        plan = ("streamed_k", tm, tk3, kp3)

    mode, tm, tk, kp = plan
    mp = _ceil_to(m, tm)

    if mp != m or kp != k:
        patches = jnp.pad(patches, ((0, mp - m), (0, kp - k)))
    if kp != k or cp != cout:
        w_mat = jnp.pad(w_mat, ((0, kp - k), (0, cp - cout)))
    shift_p = jnp.pad(shift, (0, cp - cout)).reshape(1, cp).astype(jnp.float32)

    cost = pl.CostEstimate(
        flops=2 * mp * kp * cp,
        transcendentals=0,
        bytes_accessed=int(patches.size) * 2 + int(w_mat.size) * 2 + mp * cp * 4)

    if mode == "single":
        out_flat = pl.pallas_call(
            _kernel_fused_single,
            out_shape=jax.ShapeDtypeStruct((mp, cp), jnp.float32),
            grid_spec=pltpu.PrefetchScalarGridSpec(
                num_scalar_prefetch=0,
                grid=(mp // tm,),
                in_specs=[
                    pl.BlockSpec((tm, kp), lambda i: (i, 0)),   # patch tile (streamed)
                    pl.BlockSpec((kp, cp), lambda i: (0, 0)),   # weights: fetched ONCE
                    pl.BlockSpec((1, cp), lambda i: (0, 0)),    # shift (tiny, resident)
                ],
                out_specs=pl.BlockSpec((tm, cp), lambda i: (i, 0)),
            ),
            compiler_params=pltpu.CompilerParams(
                dimension_semantics=("parallel",),
                vmem_limit_bytes=budget),
            cost_estimate=cost,
        )(patches, w_mat, shift_p)
    else:
        resident = (mode == "resident_k")
        kernel = functools.partial(_kernel_fused_ksplit, tk=tk, resident=resident)
        if resident:
            w_spec = pl.BlockSpec((kp, cp), lambda i, kk: (0, 0))   # fetched once
        else:
            w_spec = pl.BlockSpec((tk, cp), lambda i, kk: (kk, 0))  # streamed tiles
        out_flat = pl.pallas_call(
            kernel,
            out_shape=jax.ShapeDtypeStruct((mp, cp), jnp.float32),
            grid_spec=pltpu.PrefetchScalarGridSpec(
                num_scalar_prefetch=0,
                grid=(mp // tm, kp // tk),
                in_specs=[
                    pl.BlockSpec((tm, tk), lambda i, kk: (i, kk)),
                    w_spec,
                    pl.BlockSpec((1, cp), lambda i, kk: (0, 0)),
                ],
                out_specs=pl.BlockSpec((tm, cp), lambda i, kk: (i, 0)),
                scratch_shapes=[pltpu.VMEM((tm, cp), jnp.float32)],
            ),
            compiler_params=pltpu.CompilerParams(
                dimension_semantics=("parallel", "arbitrary"),
                vmem_limit_bytes=budget),
            cost_estimate=cost,
        )(patches, w_mat, shift_p)

    out = out_flat[:m, :cout].reshape(n, hout, wout, cout)
    # TODO(synk): NHWC is the kernel's natural output layout; the NCHW transpose below
    # is kept only for PyTorch API parity (one extra HBM pass) — fuse into the consumer.
    return out.transpose(0, 3, 1, 2)


# ----------------------------------------------------------------------------- reference
def _reference(x, conv_w, conv_b, bn_gamma, bn_beta, bn_mean, bn_var,
               stride, padding, eps=1e-5):
    # Mirrors the kernel's bf16 operand quantization (scale folded into weights,
    # bf16-rounded operands, f32 accumulation) so the comparison is tight.
    scale = bn_gamma / jnp.sqrt(bn_var + eps)
    shift = (conv_b - bn_mean) * scale + bn_beta
    x_q = x.astype(jnp.bfloat16).astype(jnp.float32)
    w_q = (conv_w * scale[:, None, None, None]).astype(jnp.bfloat16).astype(jnp.float32)
    y = lax.conv_general_dilated(
        x_q, w_q, window_strides=stride,
        padding=[(padding[0], padding[0]), (padding[1], padding[1])],
        dimension_numbers=("NCHW", "OIHW", "NCHW"),
        precision=lax.Precision.HIGHEST)
    y = y + shift[None, :, None, None]
    return jnp.maximum(y, 0.0)


if __name__ == "__main__":
    # Small shapes consistent with the module: Conv2dBnRelu(4, 8, 3, stride=1, padding=1)
    N, C_IN, H, W = 2, 4, 16, 16
    C_OUT, KH, KW = 8, 3, 3
    STRIDE, PADDING = (1, 1), (1, 1)

    key = jax.random.PRNGKey(0)
    kx, kw_, kb, kg, kbe, km, kv = jax.random.split(key, 7)

    x = jax.random.normal(kx, (N, C_IN, H, W), dtype=jnp.float32)
    conv_w = jax.random.normal(kw_, (C_OUT, C_IN, KH, KW), dtype=jnp.float32) * 0.1
    conv_b = jax.random.normal(kb, (C_OUT,), dtype=jnp.float32) * 0.1
    bn_gamma = 1.0 + 0.1 * jax.random.normal(kg, (C_OUT,), dtype=jnp.float32)
    bn_beta = 0.1 * jax.random.normal(kbe, (C_OUT,), dtype=jnp.float32)
    bn_mean = 0.1 * jax.random.normal(km, (C_OUT,), dtype=jnp.float32)
    bn_var = jnp.abs(jax.random.normal(kv, (C_OUT,), dtype=jnp.float32)) + 0.5

    out = conv2d_bn_relu(x, conv_w, conv_b, bn_gamma, bn_beta, bn_mean, bn_var,
                         stride=STRIDE, padding=PADDING)
    out = jax.block_until_ready(out)

    ref = _reference(x, conv_w, conv_b, bn_gamma, bn_beta, bn_mean, bn_var,
                     STRIDE, PADDING)
    assert out.shape == (N, C_OUT, H, W), out.shape
    err = float(jnp.max(jnp.abs(out - ref)))
    assert jnp.allclose(out, ref, atol=1e-3, rtol=1e-3), err

    print("KERNEL_OK")
</pallas_src>

<mosaic_0001>
module attributes {stable_mosaic.version = 11 : i64} {
  func.func @_kernel_fused_single(%arg0: i32, %arg1: memref<128x36xbf16, #tpu.memory_space<vmem>>, %arg2: memref<36x128xbf16, #tpu.memory_space<vmem>>, %arg3: memref<1x128xf32, #tpu.memory_space<vmem>>, %arg4: memref<128x128xf32, #tpu.memory_space<vmem>>) attributes {dimension_semantics = [#tpu.dimension_semantics<parallel>], iteration_bounds = array<i64: 4>, scalar_prefetch = 0 : i64, scratch_operands = 0 : i64, tpu.core_type = #tpu.core_type<tc>, window_params = [{transform_indices = @transform_0, window_bounds = array<i64: 128, 36>}, {pipeline_mode = #tpu.pipeline_mode<synchronous>, transform_indices = @transform_1, window_bounds = array<i64: 36, 128>}, {pipeline_mode = #tpu.pipeline_mode<synchronous>, transform_indices = @transform_2, window_bounds = array<i64: 1, 128>}, {transform_indices = @transform_3, window_bounds = array<i64: 128, 128>}]} {
    %c0 = arith.constant 0 : index
    %c0_0 = arith.constant 0 : index
    %0 = vector.load %arg1[%c0, %c0_0] : memref<128x36xbf16, #tpu.memory_space<vmem>>, vector<128x36xbf16>
    %c0_1 = arith.constant 0 : index
    %c0_2 = arith.constant 0 : index
    %1 = vector.load %arg2[%c0_1, %c0_2] : memref<36x128xbf16, #tpu.memory_space<vmem>>, vector<36x128xbf16>
    %cst = arith.constant dense<0.000000e+00> : vector<128x128xf32>
    %2 = tpu.matmul %0, %1, %cst {dimension_numbers = #tpu.dot_dimension_numbers<[1], [0], [0], [1], [0, 0, 1, 1], [], []>} : vector<128x36xbf16>, vector<36x128xbf16>, vector<128x128xf32> -> vector<128x128xf32>
    %c0_3 = arith.constant 0 : index
    %c0_4 = arith.constant 0 : index
    %3 = vector.load %arg3[%c0_3, %c0_4] : memref<1x128xf32, #tpu.memory_space<vmem>>, vector<1x128xf32>
    %4 = vector.broadcast %3 : vector<1x128xf32> to vector<128x128xf32>
    %5 = arith.addf %2, %4 : vector<128x128xf32>
    %cst_5 = arith.constant 0.000000e+00 : f32
    %6 = vector.broadcast %cst_5 : f32 to vector<128x128xf32>
    %7 = arith.maximumf %5, %6 : vector<128x128xf32>
    %c0_6 = arith.constant 0 : index
    %c0_7 = arith.constant 0 : index
    %8 = vector.load %arg4[%c0_6, %c0_7] : memref<128x128xf32, #tpu.memory_space<vmem>>, vector<128x128xf32>
    tpu.vector_store %arg4[%c0_6, %c0_7], %7 {strides = array<i32>} : memref<128x128xf32, #tpu.memory_space<vmem>>, vector<128x128xf32>,
    return
  }
  func.func @transform_0(%arg0: i32) -> (i32, i32) {
    %c0_i32 = arith.constant 0 : i32
    %c0_i32_0 = arith.constant 0 : i32
    return %arg0, %c0_i32 : i32, i32
  }
  func.func @transform_1(%arg0: i32) -> (i32, i32) {
    %c0_i32 = arith.constant 0 : i32
    %c0_i32_0 = arith.constant 0 : i32
    %c0_i32_1 = arith.constant 0 : i32
    return %c0_i32, %c0_i32_0 : i32, i32
  }
  func.func @transform_2(%arg0: i32) -> (i32, i32) {
    %c0_i32 = arith.constant 0 : i32
    %c0_i32_0 = arith.constant 0 : i32
    %c0_i32_1 = arith.constant 0 : i32
    return %c0_i32, %c0_i32_0 : i32, i32
  }
  func.func @transform_3(%arg0: i32) -> (i32, i32) {
    %c0_i32 = arith.constant 0 : i32
    %c0_i32_0 = arith.constant 0 : i32
    return %arg0, %c0_i32 : i32, i32
  }
}

</mosaic_0001>

<bundles_post_ra>
// kernel: conv2d_bn_relu.1
= control target key start
LH: loop header
LB: loop body
LE: loop exit
PB: predicated region body
PF: predicated region fallthrough
CT: control target
= control target key end

     0   :  { %s591_s12 = smov 0   ;;  %s650_s0 = inlined_call_operand.vmem [shape: bf16[512,36], index: 0, kind: input, shape index: {}]   ;;  %s651_s1 = inlined_call_operand.vmem [shape: bf16[36,128], index: 1, kind: input, shape index: {}]   ;;  %s652_s2 = inlined_call_operand.vmem [shape: f32[1,128], index: 2, kind: input, shape index: {}]   ;;  %s653_s3 = inlined_call_operand.vmem [shape: f32[512,128], index: 3, kind: output, shape index: {}]  }
   0x1 LB: > { %s472_s13 = sadd.s32 4294967295, %s569_s12   ;;  %p476_p0 = scmp.ge.s32.totalorder %s569_s12, 1  ;;  %s569_s12 = sphi %s591_s12, %s13_s12  }
   0x2   : > { %p138_p1 = scmp.lt.s32.totalorder %s569_s12, 5 }
   0x4   : > { %p139_p2 = pnand %p476_p0, %p138_p1 }
   0x5   : > { %v552_v0 = vld [vmem:[%s651_s1] sm:$0xff] (!%p139_p2)   ;;  %v553_v1 = vld [vmem:[%s651_s1 + $0x8] sm:$0xff] (!%p139_p2)   ;;  %s477_s18 = sshll.u32 (!%p139_p2), %s472_s13, 4  ;;  %v554_v2 = vld [vmem:[%s651_s1 + $0x10] ss:$0 sps:$4 sm:$0x33] (!%p139_p2)  }
   0x6   : > { %142 = sbr.rel (%p139_p2) target bundleno = 247 (0xf7), region = 32  ;;  %514 = vmatprep.subr.bf16.mxu0 (!%p139_p2), %v552_v0  ;;  %536 = vmatprep.subr.bf16.mxu1 (!%p139_p2), %v552_v0  ;;  %p163_p3 = scmp.lt.s32.totalorder (!%p139_p2), %s477_s18, 63  ;;  %vm283_vm0 = vcmask (!%p139_p2), 1041408   ;;  %vm258_vm1 = vcmask (!%p139_p2), 293888   ;;  %v481_v12 = vld [vmem:[%s652_s2] ss:$0 sm:$0xff] (!%p139_p2) }
   0x7   : > { %515 = vmatpush3.bf16.msra.mxu0 (!%p139_p2), %v552_v0  ;;  %539 = vmatpush3.bf16.msra.mxu1 (!%p139_p2), %v552_v0  ;;  %v285_v3 = vsel (!%p139_p2), %vm283_vm0, %v554_v2, 0 }
   0x8   : > { %516 = vmatprep.subr.bf16.mxu0 (!%p139_p2), %v553_v1  ;;  %537 = vmatprep.subr.bf16.mxu1 (!%p139_p2), %v553_v1 }
   0xb   : > { %517 = vmatpush3.bf16.msra.mxu0 (!%p139_p2), %v553_v1  ;;  %540 = vmatpush3.bf16.msra.mxu1 (!%p139_p2), %v553_v1 }
   0xc   : > { %542 = vmatprep.subr.msk.bf16.mxu0 (!%p139_p2), %vm283_vm0, %v554_v2  ;;  %543 = vmatprep.subr.msk.bf16.mxu1 (!%p139_p2), %vm283_vm0, %v554_v2 }
   0xd   : > { %s655_s18 = smov (!%p163_p3, %s477_s18), 63 }
   0xe   : > { %s478_s21 = sshll.u32 %s655_s18, 2  ;;  %s480_s27 = sshll.u32 %s655_s18, 3 }
   0xf   : > { %s166_s24 = scalar_lea.vmem %s650_s0, %s478_s21  ;;  %519 = vmatpush3.bf16.msra.mxu0 %v285_v3  ;;  %541 = vmatpush3.bf16.msra.mxu1 %v285_v3  ;;  %s629_s30 = scalar_lea.vmem %s653_s3, %s480_s27 }
  0x10   : > { %v555_v4 = vld [vmem:[%s166_s24] sm:$0xff]   ;;  %v557_v6 = vld [vmem:[%s166_s24 + $0x8] sm:$0xff]   ;;  %v559_v8 = vld [vmem:[%s166_s24 + $0x10] sm:$0xff]  }
  0x11   : > { %v556_v5 = vld [vmem:[%s166_s24 + $0x20] sm:$0xff]   ;;  %520 = vmatprep.mubr.msk.bf16.mxu0 %vm258_vm1, %v555_v4  ;;  %v558_v7 = vld [vmem:[%s166_s24 + $0x28] sm:$0xff]   ;;  %v560_v9 = vld [vmem:[%s166_s24 + $0x30] sm:$0xff]  }
  0x12   : > { %528 = vmatprep.mubr.msk.bf16.mxu1 %vm258_vm1, %v556_v5  ;;  %521 = vmatmul.mubr.msk.bf16.vlgmr.msra.gmra.mrb[0].mxu0 %vm258_vm1, %v557_v6  ;;  %v561_v10 = vld [vmem:[%s166_s24 + $0x18] sm:$0xff]  }
  0x13   : > { %529 = vmatmul.mubr.msk.bf16.vlgmr.msra.gmra.mrb[0].mxu1 %vm258_vm1, %v558_v7  ;;  %524 = vmatprep.mubr.msk.bf16.mxu0 %vm258_vm1, %v559_v8  ;;  %v562_v11 = vld [vmem:[%s166_s24 + $0x38] sm:$0xff]  }
  0x14   : > { %532 = vmatprep.mubr.msk.bf16.mxu1 %vm258_vm1, %v560_v9 }
  0x1a   : > { %525 = vmatmul.mubr.msk.bf16.gmra.mrb[4].mxu0 %vm258_vm1, %v561_v10 }
  0x1b   : > { %533 = vmatmul.mubr.msk.bf16.gmra.mrb[4].mxu1 %vm258_vm1, %v562_v11 }
  0xe5   : > { %v522_v13 = vpop.f32.mrb[0].mxu0 }
  0xe6   : > { %v530_v14 = vpop.f32.mrb[0].mxu1  ;;  %v330_v15 = vadd.f32 %v522_v13, %v481_v12  ;;  %v321_v17 = vpop.f32.mrb[1].mxu0 }
  0xe7   : > { %v362_v16 = vadd.f32 %v530_v14, %v481_v12  ;;  %v353_v18 = vpop.f32.mrb[1].mxu1  ;;  %v322_v19 = vadd.f32 %v481_v12, %v321_v17  ;;  %v523_v21 = vpop.f32.mrb[2].mxu0 }
  0xe8   : > { %v354_v20 = vadd.f32 %v481_v12, %v353_v18  ;;  %v531_v22 = vpop.f32.mrb[2].mxu1  ;;  %v386_v23 = vmax.f32 %v330_v15, 0.0  ;;  %v333_v25 = vadd.f32 %v523_v21, %v481_v12  ;;  %v324_v27 = vpop.f32.mrb[3].mxu0 }
  0xe9   : > { %v394_v24 = vmax.f32 %v362_v16, 0.0  ;;  %v365_v26 = vadd.f32 %v531_v22, %v481_v12  ;;  %v356_v28 = vpop.f32.mrb[3].mxu1  ;;  %v384_v29 = vmax.f32 %v322_v19, 0.0  ;;  %v325_v31 = vadd.f32 %v481_v12, %v324_v27 }
  0xea   : > { %v392_v30 = vmax.f32 %v354_v20, 0.0  ;;  %v357_v32 = vadd.f32 %v481_v12, %v356_v28  ;;  %402 = vst [vmem:[%s629_s30 + $0x10] sm:$0xff] %v386_v23  ;;  %v387_v33 = vmax.f32 %v333_v25, 0.0 }
  0xeb   : > { %410 = vst [vmem:[%s629_s30 + $0x50] sm:$0xff] %v394_v24  ;;  %v395_v34 = vmax.f32 %v365_v26, 0.0  ;;  %400 = vst [vmem:[%s629_s30] sm:$0xff] %v384_v29  ;;  %v385_v35 = vmax.f32 %v325_v31, 0.0 }
  0xec   : > { %408 = vst [vmem:[%s629_s30 + $0x40] sm:$0xff] %v392_v30  ;;  %v393_v36 = vmax.f32 %v357_v32, 0.0  ;;  %403 = vst [vmem:[%s629_s30 + $0x18] sm:$0xff] %v387_v33 }
  0xed   : > { %411 = vst [vmem:[%s629_s30 + $0x58] sm:$0xff] %v395_v34  ;;  %401 = vst [vmem:[%s629_s30 + $0x8] sm:$0xff] %v385_v35  ;;  %v526_v37 = vpop.f32.mrb[4].mxu0 }
  0xee   : > { %409 = vst [vmem:[%s629_s30 + $0x48] sm:$0xff] %v393_v36  ;;  %v534_v38 = vpop.f32.mrb[4].mxu1  ;;  %v346_v39 = vadd.f32 %v526_v37, %v481_v12  ;;  %v337_v41 = vpop.f32.mrb[5].mxu0 }
  0xef   : > { %v378_v40 = vadd.f32 %v534_v38, %v481_v12  ;;  %v369_v42 = vpop.f32.mrb[5].mxu1  ;;  %v338_v43 = vadd.f32 %v481_v12, %v337_v41  ;;  %v527_v45 = vpop.f32.mrb[6].mxu0 }
  0xf0   : > { %v370_v44 = vadd.f32 %v481_v12, %v369_v42  ;;  %v535_v46 = vpop.f32.mrb[6].mxu1  ;;  %v390_v47 = vmax.f32 %v346_v39, 0.0  ;;  %v349_v49 = vadd.f32 %v527_v45, %v481_v12  ;;  %v340_v51 = vpop.f32.mrb[7].mxu0 }
  0xf1   : > { %v398_v48 = vmax.f32 %v378_v40, 0.0  ;;  %v381_v50 = vadd.f32 %v535_v46, %v481_v12  ;;  %v372_v52 = vpop.f32.mrb[7].mxu1  ;;  %v388_v53 = vmax.f32 %v338_v43, 0.0  ;;  %v341_v55 = vadd.f32 %v481_v12, %v340_v51 }
  0xf2   : > { %v396_v54 = vmax.f32 %v370_v44, 0.0  ;;  %v373_v56 = vadd.f32 %v481_v12, %v372_v52  ;;  %406 = vst [vmem:[%s629_s30 + $0x30] sm:$0xff] %v390_v47  ;;  %v391_v57 = vmax.f32 %v349_v49, 0.0 }
  0xf3   : > { %414 = vst [vmem:[%s629_s30 + $0x70] sm:$0xff] %v398_v48  ;;  %v399_v58 = vmax.f32 %v381_v50, 0.0  ;;  %404 = vst [vmem:[%s629_s30 + $0x20] sm:$0xff] %v388_v53  ;;  %v389_v59 = vmax.f32 %v341_v55, 0.0 }
  0xf4   : > { %412 = vst [vmem:[%s629_s30 + $0x60] sm:$0xff] %v396_v54  ;;  %v397_v60 = vmax.f32 %v373_v56, 0.0  ;;  %407 = vst [vmem:[%s629_s30 + $0x38] sm:$0xff] %v391_v57 }
  0xf5   : > { %415 = vst [vmem:[%s629_s30 + $0x78] sm:$0xff] %v399_v58  ;;  %405 = vst [vmem:[%s629_s30 + $0x28] sm:$0xff] %v389_v59 }
  0xf6   : > { %413 = vst [vmem:[%s629_s30 + $0x68] sm:$0xff] %v397_v60 }
  0xf7 PF: > { %s13_s12 = sadd.s32 1, %s569_s12  }
  0xf8   : > { %p10_p4 = scmp.ge.s32.totalorder %s13_s12, 6  }
  0xfa   :  { %12 = sbr.rel (!%p10_p4) target bundleno = 1 (0x1), region = 62 }

</bundles_post_ra>
